<compile_context>
chip_gen: v7x
topology: tpu7x:2x2x1
jax: 0.10.0
libtpu: 0.0.40
codegen_flags: <defaults>
</compile_context>

<pallas_src>
import jax
import jax.numpy as jnp
from jax.experimental import pallas as pl
from jax.experimental.pallas import tpu as pltpu


def _round_up(a, m):
    return ((a + m - 1) // m) * m


def mlp_policy_kernel(xT_ref, g_ref, w1_ref, b1_ref, w2_ref, b2_ref,
                      w3_ref, b3_ref, logitsT_ref, action_ref):
    # ---- hot path: 3 matmuls + tanh, all in (feature, batch) layout ----
    xT = xT_ref[...]                                                   # (n_in, TB)
    h1 = jnp.tanh(
        jnp.dot(w1_ref[...], xT, preferred_element_type=jnp.float32)
        + b1_ref[...])                                                 # (n_h, TB)
    h2 = jnp.tanh(
        jnp.dot(w2_ref[...], h1, preferred_element_type=jnp.float32)
        + b2_ref[...])                                                 # (n_h, TB)
    logitsT = (
        jnp.dot(w3_ref[...], h2, preferred_element_type=jnp.float32)
        + b3_ref[...])                                                 # (n_out, TB)
    logitsT_ref[...] = logitsT

    # ---- Categorical(logits).sample() via Gumbel-max ----
    # Gumbel noise arrives as a lane-dense (n_out, TB) input block.
    z = logitsT + g_ref[...]                                           # (n_out, TB)
    n_out = z.shape[0]
    # Single fused max-with-index sweep over the n_out rows (strict ">" keeps the
    # first index attaining the max, matching argmax tie-breaking).
    best_v = z[0:1, :]                                                 # (1, TB)
    best_i = jnp.zeros_like(best_v, dtype=jnp.int32)
    for r in range(1, n_out):
        v = z[r:r + 1, :]
        take = v > best_v
        best_v = jnp.where(take, v, best_v)
        best_i = jnp.where(take, jnp.int32(r), best_i)
    action_ref[...] = best_i                                           # (1, TB)


def pack_params(params):
    """One-time repack: keep torch (out, in) weight layout; biases -> column vectors.

    Call this OUTSIDE the per-step jitted forward so no transpose/reshape HLOs
    appear on the hot path.
    """
    return (
        jnp.asarray(params["main.0.weight"], jnp.float32),             # (n_h, n_in)
        jnp.asarray(params["main.0.bias"], jnp.float32)[:, None],      # (n_h, 1)
        jnp.asarray(params["main.2.weight"], jnp.float32),             # (n_h, n_h)
        jnp.asarray(params["main.2.bias"], jnp.float32)[:, None],      # (n_h, 1)
        jnp.asarray(params["main.4.weight"], jnp.float32),             # (n_out, n_h)
        jnp.asarray(params["main.4.bias"], jnp.float32)[:, None],      # (n_out, 1)
    )


def mlp_policy_forward(s, packed_params, sample_key, *, tile_b=1024):
    """s: (B, n_in) float32.  packed_params: output of pack_params.
    sample_key: jax PRNG key for the categorical sample.

    Returns (logits (B, n_out) float32, action (B,) int32).
    The PyTorch module's forward returns only the action; logits are returned
    here as well for verification.
    """
    w1, b1, w2, b2, w3, b3 = packed_params
    n_h, n_in = w1.shape
    n_out = w3.shape[0]
    B = s.shape[0]

    # Batch tiling: batch lives on the 128-lane axis, so pad/tile in units of 128.
    b_pad = max(128, _round_up(B, 128))
    tb = min(tile_b, b_pad)
    if b_pad >= 256:
        # Keep at least 2 batch tiles so ("parallel",) can feed both v7x TensorCores.
        tb = min(tb, max(128, _round_up((b_pad + 1) // 2, 128)))
    b_pad = _round_up(b_pad, tb)
    num_tiles = b_pad // tb

    # Lane-dense (feature, batch) inputs.  The transpose/pad are cheap layout
    # plumbing outside the kernel.
    xT = jnp.pad(s.astype(jnp.float32), ((0, b_pad - B), (0, 0))).T    # (n_in, b_pad)
    gT = jax.random.gumbel(sample_key, (n_out, b_pad), jnp.float32)    # (n_out, b_pad)

    grid_spec = pltpu.PrefetchScalarGridSpec(
        num_scalar_prefetch=0,
        grid=(num_tiles,),
        in_specs=[
            pl.BlockSpec((n_in, tb), lambda i: (0, i)),       # xT batch tile
            pl.BlockSpec((n_out, tb), lambda i: (0, i)),      # gumbel batch tile
            pl.BlockSpec((n_h, n_in), lambda i: (0, 0)),      # w1 (VMEM-resident)
            pl.BlockSpec((n_h, 1), lambda i: (0, 0)),         # b1
            pl.BlockSpec((n_h, n_h), lambda i: (0, 0)),       # w2
            pl.BlockSpec((n_h, 1), lambda i: (0, 0)),         # b2
            pl.BlockSpec((n_out, n_h), lambda i: (0, 0)),     # w3
            pl.BlockSpec((n_out, 1), lambda i: (0, 0)),       # b3
        ],
        out_specs=(
            pl.BlockSpec((n_out, tb), lambda i: (0, i)),      # logitsT (lane-dense)
            pl.BlockSpec((1, tb), lambda i: (0, i)),          # action  (lane-dense)
        ),
    )

    logitsT, action = pl.pallas_call(
        mlp_policy_kernel,
        out_shape=(
            jax.ShapeDtypeStruct((n_out, b_pad), jnp.float32),
            jax.ShapeDtypeStruct((1, b_pad), jnp.int32),
        ),
        grid_spec=grid_spec,
        compiler_params=pltpu.CompilerParams(
            dimension_semantics=("parallel",),   # v7x: shard batch tiles over both TCs
        ),
    )(xT, gT, w1, b1, w2, b2, w3, b3)

    return logitsT[:, :B].T, action[0, :B]


def init_params(key, n_in, n_h, n_out):
    """Deterministic init mirroring nn.Linear default (uniform +/- 1/sqrt(fan_in)),
    stored in torch layout (out, in) to match the PyTorch state_dict."""
    ks = jax.random.split(key, 6)

    def lin(kw, kb, fan_in, fan_out):
        bound = 1.0 / jnp.sqrt(jnp.float32(fan_in))
        w = jax.random.uniform(kw, (fan_out, fan_in), jnp.float32, -bound, bound)
        b = jax.random.uniform(kb, (fan_out,), jnp.float32, -bound, bound)
        return w, b

    w1, b1 = lin(ks[0], ks[1], n_in, n_h)
    w2, b2 = lin(ks[2], ks[3], n_h, n_h)
    w3, b3 = lin(ks[4], ks[5], n_h, n_out)
    return {
        "main.0.weight": w1, "main.0.bias": b1,
        "main.2.weight": w2, "main.2.bias": b2,
        "main.4.weight": w3, "main.4.bias": b3,
    }


if __name__ == "__main__":
    n_in, n_h, n_out = 16, 32, 8
    batch = 4

    key = jax.random.PRNGKey(0)
    k_param, k_input, k_sample = jax.random.split(key, 3)

    params = init_params(k_param, n_in, n_h, n_out)      # torch layout
    packed = pack_params(params)                         # one-time repack
    s = jax.random.normal(k_input, (batch, n_in), jnp.float32)

    fwd = jax.jit(mlp_policy_forward)
    logits, action = fwd(s, packed, k_sample)
    jax.block_until_ready((logits, action))

    # ---- sanity checks against a pure-JAX reference ----
    hp = jax.lax.Precision.HIGHEST
    h1 = jnp.tanh(jnp.dot(s, params["main.0.weight"].T, precision=hp)
                  + params["main.0.bias"])
    h2 = jnp.tanh(jnp.dot(h1, params["main.2.weight"].T, precision=hp)
                  + params["main.2.bias"])
    ref_logits = (jnp.dot(h2, params["main.4.weight"].T, precision=hp)
                  + params["main.4.bias"])
    assert logits.shape == (batch, n_out)
    assert jnp.allclose(logits, ref_logits, atol=1e-3, rtol=1e-3)

    # Actions: correct shape/dtype/range, deterministic given the same key.
    assert action.shape == (batch,) and action.dtype == jnp.int32
    assert bool(jnp.all((action >= 0) & (action < n_out)))
    logits2, action2 = fwd(s, packed, k_sample)
    jax.block_until_ready((logits2, action2))
    assert jnp.array_equal(action, action2)

    # Gumbel-max with the same noise must equal argmax(logits + g).
    gT = jax.random.gumbel(k_sample, (n_out, 128), jnp.float32)
    ref_action = jnp.argmax(ref_logits + gT[:, :batch].T, axis=-1).astype(jnp.int32)
    assert jnp.array_equal(action, ref_action)

    print("KERNEL_OK")
</pallas_src>

<mosaic_0001>
module attributes {stable_mosaic.version = 11 : i64} {
  func.func @mlp_policy_kernel(%arg0: i32, %arg1: memref<16x128xf32, #tpu.memory_space<vmem>>, %arg2: memref<8x128xf32, #tpu.memory_space<vmem>>, %arg3: memref<32x16xf32, #tpu.memory_space<vmem>>, %arg4: memref<32x1xf32, #tpu.memory_space<vmem>>, %arg5: memref<32x32xf32, #tpu.memory_space<vmem>>, %arg6: memref<32x1xf32, #tpu.memory_space<vmem>>, %arg7: memref<8x32xf32, #tpu.memory_space<vmem>>, %arg8: memref<8x1xf32, #tpu.memory_space<vmem>>, %arg9: memref<8x128xf32, #tpu.memory_space<vmem>>, %arg10: memref<1x128xi32, #tpu.memory_space<vmem>>) attributes {dimension_semantics = [#tpu.dimension_semantics<parallel>], iteration_bounds = array<i64: 1>, scalar_prefetch = 0 : i64, scratch_operands = 0 : i64, tpu.core_type = #tpu.core_type<tc>, window_params = [{transform_indices = @transform_0, window_bounds = array<i64: 16, 128>}, {transform_indices = @transform_1, window_bounds = array<i64: 8, 128>}, {pipeline_mode = #tpu.pipeline_mode<synchronous>, transform_indices = @transform_2, window_bounds = array<i64: 32, 16>}, {pipeline_mode = #tpu.pipeline_mode<synchronous>, transform_indices = @transform_3, window_bounds = array<i64: 32, 1>}, {pipeline_mode = #tpu.pipeline_mode<synchronous>, transform_indices = @transform_4, window_bounds = array<i64: 32, 32>}, {pipeline_mode = #tpu.pipeline_mode<synchronous>, transform_indices = @transform_5, window_bounds = array<i64: 32, 1>}, {pipeline_mode = #tpu.pipeline_mode<synchronous>, transform_indices = @transform_6, window_bounds = array<i64: 8, 32>}, {pipeline_mode = #tpu.pipeline_mode<synchronous>, transform_indices = @transform_7, window_bounds = array<i64: 8, 1>}, {transform_indices = @transform_8, window_bounds = array<i64: 8, 128>}, {transform_indices = @transform_9, window_bounds = array<i64: 1, 128>}]} {
    %c0 = arith.constant 0 : index
    %c0_0 = arith.constant 0 : index
    %0 = vector.load %arg1[%c0, %c0_0] : memref<16x128xf32, #tpu.memory_space<vmem>>, vector<16x128xf32>
    %c0_1 = arith.constant 0 : index
    %c0_2 = arith.constant 0 : index
    %1 = vector.load %arg3[%c0_1, %c0_2] : memref<32x16xf32, #tpu.memory_space<vmem>>, vector<32x16xf32>
    %cst = arith.constant dense<0.000000e+00> : vector<32x128xf32>
    %2 = tpu.matmul %1, %0, %cst {dimension_numbers = #tpu.dot_dimension_numbers<[1], [0], [0], [1], [0, 0, 1, 1], [], []>} : vector<32x16xf32>, vector<16x128xf32>, vector<32x128xf32> -> vector<32x128xf32>
    %c0_3 = arith.constant 0 : index
    %c0_4 = arith.constant 0 : index
    %3 = vector.load %arg4[%c0_3, %c0_4] : memref<32x1xf32, #tpu.memory_space<vmem>>, vector<32x1xf32>
    %4 = vector.broadcast %3 : vector<32x1xf32> to vector<32x128xf32>
    %5 = arith.addf %2, %4 : vector<32x128xf32>
    %6 = math.tanh %5 : vector<32x128xf32>
    %c0_5 = arith.constant 0 : index
    %c0_6 = arith.constant 0 : index
    %7 = vector.load %arg5[%c0_5, %c0_6] : memref<32x32xf32, #tpu.memory_space<vmem>>, vector<32x32xf32>
    %cst_7 = arith.constant dense<0.000000e+00> : vector<32x128xf32>
    %8 = tpu.matmul %7, %6, %cst_7 {dimension_numbers = #tpu.dot_dimension_numbers<[1], [0], [0], [1], [0, 0, 1, 1], [], []>} : vector<32x32xf32>, vector<32x128xf32>, vector<32x128xf32> -> vector<32x128xf32>
    %c0_8 = arith.constant 0 : index
    %c0_9 = arith.constant 0 : index
    %9 = vector.load %arg6[%c0_8, %c0_9] : memref<32x1xf32, #tpu.memory_space<vmem>>, vector<32x1xf32>
    %10 = vector.broadcast %9 : vector<32x1xf32> to vector<32x128xf32>
    %11 = arith.addf %8, %10 : vector<32x128xf32>
    %12 = math.tanh %11 : vector<32x128xf32>
    %c0_10 = arith.constant 0 : index
    %c0_11 = arith.constant 0 : index
    %13 = vector.load %arg7[%c0_10, %c0_11] : memref<8x32xf32, #tpu.memory_space<vmem>>, vector<8x32xf32>
    %cst_12 = arith.constant dense<0.000000e+00> : vector<8x128xf32>
    %14 = tpu.matmul %13, %12, %cst_12 {dimension_numbers = #tpu.dot_dimension_numbers<[1], [0], [0], [1], [0, 0, 1, 1], [], []>} : vector<8x32xf32>, vector<32x128xf32>, vector<8x128xf32> -> vector<8x128xf32>
    %c0_13 = arith.constant 0 : index
    %c0_14 = arith.constant 0 : index
    %15 = vector.load %arg8[%c0_13, %c0_14] : memref<8x1xf32, #tpu.memory_space<vmem>>, vector<8x1xf32>
    %16 = vector.broadcast %15 : vector<8x1xf32> to vector<8x128xf32>
    %17 = arith.addf %14, %16 : vector<8x128xf32>
    %c0_15 = arith.constant 0 : index
    %c0_16 = arith.constant 0 : index
    %18 = vector.load %arg9[%c0_15, %c0_16] : memref<8x128xf32, #tpu.memory_space<vmem>>, vector<8x128xf32>
    tpu.vector_store %arg9[%c0_15, %c0_16], %17 {strides = array<i32>} : memref<8x128xf32, #tpu.memory_space<vmem>>, vector<8x128xf32>,
    %c0_17 = arith.constant 0 : index
    %c0_18 = arith.constant 0 : index
    %19 = vector.load %arg2[%c0_17, %c0_18] : memref<8x128xf32, #tpu.memory_space<vmem>>, vector<8x128xf32>
    %20 = arith.addf %17, %19 : vector<8x128xf32>
    %21 = vector.extract_strided_slice %20 {offsets = [0, 0], sizes = [1, 128], strides = [1, 1]} : vector<8x128xf32> to vector<1x128xf32>
    %c0_i32 = arith.constant 0 : i32
    %22 = vector.broadcast %c0_i32 : i32 to vector<1x128xi32>
    %23 = vector.extract_strided_slice %20 {offsets = [1, 0], sizes = [1, 128], strides = [1, 1]} : vector<8x128xf32> to vector<1x128xf32>
    %24 = arith.cmpf ogt, %23, %21 : vector<1x128xf32>
    %25 = arith.select %24, %23, %21 : vector<1x128xi1>, vector<1x128xf32>
    %c1_i32 = arith.constant 1 : i32
    %26 = vector.broadcast %c1_i32 : i32 to vector<1x128xi32>
    %27 = arith.select %24, %26, %22 : vector<1x128xi1>, vector<1x128xi32>
    %28 = vector.extract_strided_slice %20 {offsets = [2, 0], sizes = [1, 128], strides = [1, 1]} : vector<8x128xf32> to vector<1x128xf32>
    %29 = arith.cmpf ogt, %28, %25 : vector<1x128xf32>
    %30 = arith.select %29, %28, %25 : vector<1x128xi1>, vector<1x128xf32>
    %c2_i32 = arith.constant 2 : i32
    %31 = vector.broadcast %c2_i32 : i32 to vector<1x128xi32>
    %32 = arith.select %29, %31, %27 : vector<1x128xi1>, vector<1x128xi32>
    %33 = vector.extract_strided_slice %20 {offsets = [3, 0], sizes = [1, 128], strides = [1, 1]} : vector<8x128xf32> to vector<1x128xf32>
    %34 = arith.cmpf ogt, %33, %30 : vector<1x128xf32>
    %35 = arith.select %34, %33, %30 : vector<1x128xi1>, vector<1x128xf32>
    %c3_i32 = arith.constant 3 : i32
    %36 = vector.broadcast %c3_i32 : i32 to vector<1x128xi32>
    %37 = arith.select %34, %36, %32 : vector<1x128xi1>, vector<1x128xi32>
    %38 = vector.extract_strided_slice %20 {offsets = [4, 0], sizes = [1, 128], strides = [1, 1]} : vector<8x128xf32> to vector<1x128xf32>
    %39 = arith.cmpf ogt, %38, %35 : vector<1x128xf32>
    %40 = arith.select %39, %38, %35 : vector<1x128xi1>, vector<1x128xf32>
    %c4_i32 = arith.constant 4 : i32
    %41 = vector.broadcast %c4_i32 : i32 to vector<1x128xi32>
    %42 = arith.select %39, %41, %37 : vector<1x128xi1>, vector<1x128xi32>
    %43 = vector.extract_strided_slice %20 {offsets = [5, 0], sizes = [1, 128], strides = [1, 1]} : vector<8x128xf32> to vector<1x128xf32>
    %44 = arith.cmpf ogt, %43, %40 : vector<1x128xf32>
    %45 = arith.select %44, %43, %40 : vector<1x128xi1>, vector<1x128xf32>
    %c5_i32 = arith.constant 5 : i32
    %46 = vector.broadcast %c5_i32 : i32 to vector<1x128xi32>
    %47 = arith.select %44, %46, %42 : vector<1x128xi1>, vector<1x128xi32>
    %48 = vector.extract_strided_slice %20 {offsets = [6, 0], sizes = [1, 128], strides = [1, 1]} : vector<8x128xf32> to vector<1x128xf32>
    %49 = arith.cmpf ogt, %48, %45 : vector<1x128xf32>
    %50 = arith.select %49, %48, %45 : vector<1x128xi1>, vector<1x128xf32>
    %c6_i32 = arith.constant 6 : i32
    %51 = vector.broadcast %c6_i32 : i32 to vector<1x128xi32>
    %52 = arith.select %49, %51, %47 : vector<1x128xi1>, vector<1x128xi32>
    %53 = vector.extract_strided_slice %20 {offsets = [7, 0], sizes = [1, 128], strides = [1, 1]} : vector<8x128xf32> to vector<1x128xf32>
    %54 = arith.cmpf ogt, %53, %50 : vector<1x128xf32>
    %c7_i32 = arith.constant 7 : i32
    %55 = vector.broadcast %c7_i32 : i32 to vector<1x128xi32>
    %56 = arith.select %54, %55, %52 : vector<1x128xi1>, vector<1x128xi32>
    %c0_19 = arith.constant 0 : index
    %c0_20 = arith.constant 0 : index
    %57 = vector.load %arg10[%c0_19, %c0_20] : memref<1x128xi32, #tpu.memory_space<vmem>>, vector<1x128xi32>
    tpu.vector_store %arg10[%c0_19, %c0_20], %56 {strides = array<i32>} : memref<1x128xi32, #tpu.memory_space<vmem>>, vector<1x128xi32>,
    return
  }
  func.func @transform_0(%arg0: i32) -> (i32, i32) {
    %c0_i32 = arith.constant 0 : i32
    %c0_i32_0 = arith.constant 0 : i32
    return %c0_i32, %arg0 : i32, i32
  }
  func.func @transform_1(%arg0: i32) -> (i32, i32) {
    %c0_i32 = arith.constant 0 : i32
    %c0_i32_0 = arith.constant 0 : i32
    return %c0_i32, %arg0 : i32, i32
  }
  func.func @transform_2(%arg0: i32) -> (i32, i32) {
    %c0_i32 = arith.constant 0 : i32
    %c0_i32_0 = arith.constant 0 : i32
    %c0_i32_1 = arith.constant 0 : i32
    return %c0_i32, %c0_i32_0 : i32, i32
  }
  func.func @transform_3(%arg0: i32) -> (i32, i32) {
    %c0_i32 = arith.constant 0 : i32
    %c0_i32_0 = arith.constant 0 : i32
    %c0_i32_1 = arith.constant 0 : i32
    return %c0_i32, %c0_i32_0 : i32, i32
  }
  func.func @transform_4(%arg0: i32) -> (i32, i32) {
    %c0_i32 = arith.constant 0 : i32
    %c0_i32_0 = arith.constant 0 : i32
    %c0_i32_1 = arith.constant 0 : i32
    return %c0_i32, %c0_i32_0 : i32, i32
  }
  func.func @transform_5(%arg0: i32) -> (i32, i32) {
    %c0_i32 = arith.constant 0 : i32
    %c0_i32_0 = arith.constant 0 : i32
    %c0_i32_1 = arith.constant 0 : i32
    return %c0_i32, %c0_i32_0 : i32, i32
  }
  func.func @transform_6(%arg0: i32) -> (i32, i32) {
    %c0_i32 = arith.constant 0 : i32
    %c0_i32_0 = arith.constant 0 : i32
    %c0_i32_1 = arith.constant 0 : i32
    return %c0_i32, %c0_i32_0 : i32, i32
  }
  func.func @transform_7(%arg0: i32) -> (i32, i32) {
    %c0_i32 = arith.constant 0 : i32
    %c0_i32_0 = arith.constant 0 : i32
    %c0_i32_1 = arith.constant 0 : i32
    return %c0_i32, %c0_i32_0 : i32, i32
  }
  func.func @transform_8(%arg0: i32) -> (i32, i32) {
    %c0_i32 = arith.constant 0 : i32
    %c0_i32_0 = arith.constant 0 : i32
    return %c0_i32, %arg0 : i32, i32
  }
  func.func @transform_9(%arg0: i32) -> (i32, i32) {
    %c0_i32 = arith.constant 0 : i32
    %c0_i32_0 = arith.constant 0 : i32
    return %c0_i32, %arg0 : i32, i32
  }
}

</mosaic_0001>

<bundles_post_ra>
// kernel: mlp_policy_forward.1
= control target key start
LH: loop header
LB: loop body
LE: loop exit
PB: predicated region body
PF: predicated region fallthrough
CT: control target
= control target key end

     0   :  { %vm61_vm0 = vcmask 130048   ;;  %v535_v3 = vmov 0   ;;  %vm191_vm1 = vcmask 261120   ;;  %v536_v39 = vmov 0.0|0.0   ;;  %s670_s0 = inlined_call_operand.vmem [shape: f32[16,128], index: 0, kind: input, shape index: {}]   ;;  %s671_s2 = inlined_call_operand.vmem [shape: f32[32,16], index: 2, kind: input, shape index: {}]   ;;  %s672_s3 = inlined_call_operand.vmem [shape: f32[32,1], index: 3, kind: input, shape index: {}]   ;;  %s673_s5 = inlined_call_operand.vmem [shape: f32[32,1], index: 5, kind: input, shape index: {}]   ;;  %s674_s7 = inlined_call_operand.vmem [shape: f32[8,1], index: 7, kind: input, shape index: {}]   ;;  %s675_s4 = inlined_call_operand.vmem [shape: f32[32,32], index: 4, kind: input, shape index: {}]   ;;  %s676_s6 = inlined_call_operand.vmem [shape: f32[8,32], index: 6, kind: input, shape index: {}]   ;;  %s677_s1 = inlined_call_operand.vmem [shape: f32[8,128], index: 1, kind: input, shape index: {}]   ;;  %s678_s8 = inlined_call_operand.vmem [shape: f32[8,128], index: 8, kind: output, shape index: {0}]   ;;  %s679_s9 = inlined_call_operand.vmem [shape: s32[1,128], index: 9, kind: output, shape index: {1}]  }
   0x1   :  { %v31_v0 = vld [vmem:[%s670_s0] sm:$0xff]  ;;  %v32_v1 = vld [vmem:[%s670_s0 + $0x8] sm:$0xff]  ;;  %517 = vset.pattern.permute.xlu0 %v535_v3  ;;  %518 = vset.pattern.permute.xlu1 %v535_v3  ;;  %v39_v6 = vld [vmem:[%s672_s3 + $0x10] sm:$0xff]  ;;  %vm537_vm2 = vmmov 0   ;;  %v538_v40 = vmov 0.0  }
   0x2   :  { %v33_v2 = vld [vmem:[%s671_s2] sm:$0xff]  ;;  %v495_v4 = vpack.c.bf16 %v32_v1, %v31_v0  ;;  %v34_v7 = vld [vmem:[%s671_s2 + $0x8] sm:$0xff]  ;;  %53 = vperm.xlu1 %518, %v39_v6   ;;  %v35_v9 = vld [vmem:[%s671_s2 + $0x10] sm:$0xff] }
   0x3   :  { %464 = vmatprep.mubr.msk.f32.mxu0 %vm61_vm0, %v33_v2  ;;  %v37_v5 = vld [vmem:[%s672_s3] sm:$0xff]  ;;  %v38_v8 = vld [vmem:[%s672_s3 + $0x8] sm:$0xff]  ;;  %v40_v10 = vld [vmem:[%s672_s3 + $0x18] sm:$0xff] }
   0x4   :  { %496 = vmatprep.subr.bf16.mxu0 %v495_v4  ;;  %43 = vperm.xlu0 %517, %v37_v5   ;;  %v36_v11 = vld [vmem:[%s671_s2 + $0x18] sm:$0xff]  ;;  %v167_v12 = vld [vmem:[%s673_s5] sm:$0xff]  ;;  %v168_v13 = vld [vmem:[%s673_s5 + $0x8] sm:$0xff] }
   0x5   :  { %498 = vmatpush3.bf16.msra.mxu0 %v495_v4  ;;  %v169_v14 = vld [vmem:[%s673_s5 + $0x10] sm:$0xff]  ;;  %v170_v15 = vld [vmem:[%s673_s5 + $0x18] sm:$0xff]  ;;  %v294_v16 = vld [vmem:[%s674_s7] sm:$0xff] }
   0x6   :  { %58 = vperm.xlu1 %518, %v40_v10   ;;  %v163_v17 = vld [vmem:[%s675_s4] sm:$0xff]  ;;  %v164_v36 = vld [vmem:[%s675_s4 + $0x8] sm:$0xff]  ;;  %v165_v37 = vld [vmem:[%s675_s4 + $0x10] sm:$0xff]  ;;  %507 = vmatprep.subr.bf16.mxu0 %v536_v39 }
   0x7   :  { %478 = vmatprep.mubr.msk.f32.mxu1 %vm191_vm1, %v163_v17  ;;  %v166_v38 = vld [vmem:[%s675_s4 + $0x18] sm:$0xff]  ;;  %v293_v59 = vld [vmem:[%s676_s6] sm:$0xff] }
   0x8   :  { %465 = vmatmul.mubr.msk.f32.vlgmr.msra.gmra.mrb[0].mxu0 %vm61_vm0, %v34_v7  ;;  %48 = vperm.xlu0 %517, %v38_v8   ;;  %v374_v62 = vld [vmem:[%s677_s1] sm:$0xff] }
   0x9   :  { %467 = vmatprep.mubr.msk.f32.mxu0 %vm61_vm0, %v35_v9 }
   0xa   :  { %178 = vperm.xlu1 %518, %v168_v13  }
   0xc   :  { %468 = vmatmul.mubr.msk.f32.gmra.mrb[2].mxu0 %vm61_vm0, %v36_v11  ;;  %173 = vperm.xlu0 %517, %v167_v12  }
   0xd   :  { %492 = vmatprep.mubr.msk.f32.mxu0 %vm537_vm2, %v538_v40 }
   0xe   :  { %188 = vperm.xlu1 %518, %v170_v15  }
  0x10   :  { %183 = vperm.xlu0 %517, %v169_v14  }
  0x14   :  { %297 = vperm.xlu0 %517, %v294_v16  }
  0x81   :  { %v54_v19 = vpop.permute.xlu1 %53 }
  0x83   :  { %v44_v18 = vpop.permute.xlu0 %43 }
  0x85   :  { %v59_v25 = vpop.permute.xlu1 %58 }
  0x87   :  { %v49_v20 = vpop.permute.xlu0 %48 }
  0x89   :  { %v179_v41 = vpop.permute.xlu1 %178 }
  0x8b   :  { %v174_v42 = vpop.permute.xlu0 %173 }
  0x8d   :  { %v189_v47 = vpop.permute.xlu1 %188 }
  0x8f   :  { %v184_v49 = vpop.permute.xlu0 %183 }
  0x93   :  { %v298_v60 = vpop.permute.xlu0 %297 }
  0xdb   :  { %v466_v21 = vpop.f32.mrb[0].mxu0 }
  0xdc   :  { %v146_v22 = vadd.f32 %v466_v21, %v49_v20  ;;  %v140_v23 = vpop.f32.mrb[1].mxu0 }
  0xdd   :  { %v141_v24 = vadd.f32 %v140_v23, %v44_v18 }
  0xde   :  { %519 = vtanh.f32 %v146_v22 }
  0xdf   :  { %521 = vtanh.f32 %v141_v24  ;;  %v469_v26 = vpop.f32.mrb[2].mxu0 }
  0xe0   :  { %v156_v27 = vadd.f32 %v469_v26, %v59_v25  ;;  %v150_v28 = vpop.f32.mrb[3].mxu0 }
  0xe1   :  { %v151_v29 = vadd.f32 %v150_v28, %v54_v19 }
  0xe2   :  { %523 = vtanh.f32 %v156_v27 }
  0xe3   :  { %525 = vtanh.f32 %v151_v29 }
  0xe8   :  { %v520_v30 = vpop.eup %519 }
  0xe9   :  { %v522_v31 = vpop.eup %521 }
  0xea   :  { %v499_v32 = vpack.c.bf16 %v520_v30, %v522_v31 }
  0xec   :  { %v524_v33 = vpop.eup %523  ;;  %500 = vmatprep.subr.bf16.mxu1 %v499_v32 }
  0xed   :  { %v526_v34 = vpop.eup %525  ;;  %502 = vmatpush3.bf16.msra.mxu1 %v499_v32 }
  0xee   :  { %v503_v35 = vpack.c.bf16 %v524_v33, %v526_v34 }
  0xf0   :  { %504 = vmatprep.subr.bf16.mxu1 %v503_v35 }
  0xf1   :  { %506 = vmatpush3.bf16.msra.mxu1 %v503_v35 }
  0xf4   :  { %479 = vmatmul.mubr.msk.f32.vlgmr.msra.gmra.mrb[0].mxu1 %vm191_vm1, %v164_v36 }
  0xf5   :  { %481 = vmatprep.mubr.msk.f32.mxu1 %vm191_vm1, %v165_v37 }
  0xf8   :  { %482 = vmatmul.mubr.msk.f32.gmra.mrb[2].mxu1 %vm191_vm1, %v166_v38 }
 0x1c7   :  { %v480_v43 = vpop.f32.mrb[0].mxu1 }
 0x1c8   :  { %v276_v44 = vadd.f32 %v480_v43, %v179_v41  ;;  %v270_v45 = vpop.f32.mrb[1].mxu1 }
 0x1c9   :  { %v271_v46 = vadd.f32 %v270_v45, %v174_v42 }
 0x1ca   :  { %527 = vtanh.f32 %v276_v44 }
 0x1cb   :  { %529 = vtanh.f32 %v271_v46  ;;  %v483_v48 = vpop.f32.mrb[2].mxu1 }
 0x1cc   :  { %v286_v50 = vadd.f32 %v483_v48, %v189_v47  ;;  %v280_v51 = vpop.f32.mrb[3].mxu1 }
 0x1cd   :  { %v281_v52 = vadd.f32 %v280_v51, %v184_v49 }
 0x1ce   :  { %531 = vtanh.f32 %v286_v50 }
 0x1cf   :  { %533 = vtanh.f32 %v281_v52 }
 0x1d4   :  { %v528_v53 = vpop.eup %527 }
 0x1d5   :  { %v530_v54 = vpop.eup %529 }
 0x1d6   :  { %v508_v55 = vpack.c.bf16 %v528_v53, %v530_v54 }
 0x1d8   :  { %v532_v56 = vpop.eup %531  ;;  %509 = vmatpush3.bf16.msra.mxu0 %v508_v55 }
 0x1d9   :  { %v534_v57 = vpop.eup %533  ;;  %510 = vmatprep.subr.bf16.mxu0 %v536_v39 }
 0x1da   :  { %v511_v58 = vpack.c.bf16 %v532_v56, %v534_v57 }
 0x1dc   :  { %512 = vmatpush3.bf16.msra.mxu0 %v511_v58 }
 0x1df   :  { %493 = vmatmul.mubr.msk.f32.vlgmr.msra.gmra.mrb[4].mxu0 %vm191_vm1, %v293_v59 }
 0x2b2   :  { %v369_v61 = vpop.f32.mrb[4].mxu0 }
 0x2b3   :  { %v370_v63 = vadd.f32 %v369_v61, %v298_v60  ;;  %v494_v0 = vpop.f32.mrb[5].mxu0 }
 0x2b5   :  { %373 = vst [vmem:[%s678_s8] sm:$0xff] %v370_v63  ;;  %v375_v1 = vadd.f32 %v374_v62, %v370_v63 }
 0x2b7   :  { %v377_v2 = vrot.slane %v375_v1, 7 }
 0x2b9   :  { %vm379_vm3 = vcmp.gt.f32.partialorder %v375_v1, %v377_v2 }
 0x2ba   :  { %v380_v4 = vsel %vm379_vm3, %v375_v1, %v377_v2  ;;  %v381_v5 = vsel %vm379_vm3, 1, %v535_v3 }
 0x2bb   :  { %v383_v6 = vrot.slane %v380_v4, 7  ;;  %v387_v7 = vrot.slane %v381_v5, 7 }
 0x2bd   :  { %vm385_vm4 = vcmp.gt.f32.partialorder %v375_v1, %v383_v6 }
 0x2be   :  { %v386_v8 = vsel %vm385_vm4, %v375_v1, %v383_v6  ;;  %v388_v9 = vsel %vm385_vm4, 2, %v387_v7 }
 0x2bf   :  { %v390_v10 = vrot.slane %v386_v8, 7  ;;  %v394_v11 = vrot.slane %v388_v9, 7 }
 0x2c1   :  { %vm392_vm5 = vcmp.gt.f32.partialorder %v375_v1, %v390_v10 }
 0x2c2   :  { %v393_v12 = vsel %vm392_vm5, %v375_v1, %v390_v10  ;;  %v395_v13 = vsel %vm392_vm5, 3, %v394_v11 }
 0x2c3   :  { %v397_v14 = vrot.slane %v393_v12, 7  ;;  %v401_v15 = vrot.slane %v395_v13, 7 }
 0x2c5   :  { %vm399_vm6 = vcmp.gt.f32.partialorder %v375_v1, %v397_v14 }
 0x2c6   :  { %v400_v16 = vsel %vm399_vm6, %v375_v1, %v397_v14  ;;  %v402_v17 = vsel %vm399_vm6, 4, %v401_v15 }
 0x2c7   :  { %v404_v18 = vrot.slane %v400_v16, 7  ;;  %v408_v19 = vrot.slane %v402_v17, 7 }
 0x2c9   :  { %vm406_vm7 = vcmp.gt.f32.partialorder %v375_v1, %v404_v18 }
 0x2ca   :  { %v407_v20 = vsel %vm406_vm7, %v375_v1, %v404_v18  ;;  %v409_v3 = vsel %vm406_vm7, 5, %v408_v19 }
 0x2cb   :  { %v411_v21 = vrot.slane %v407_v20, 7  ;;  %v415_v22 = vrot.slane %v409_v3, 7 }
 0x2cd   :  { %vm413_vm8 = vcmp.gt.f32.partialorder %v375_v1, %v411_v21 }
 0x2ce   :  { %v414_v23 = vsel %vm413_vm8, %v375_v1, %v411_v21  ;;  %v416_v24 = vsel %vm413_vm8, 6, %v415_v22 }
 0x2cf   :  { %v418_v25 = vrot.slane %v414_v23, 7  ;;  %v421_v26 = vrot.slane %v416_v24, 7 }
 0x2d1   :  { %vm420_vm9 = vcmp.gt.f32.partialorder %v375_v1, %v418_v25 }
 0x2d2   :  { %v422_v27 = vsel %vm420_vm9, 7, %v421_v26 }
 0x2d3   :  { %423 = vst [vmem:[%s679_s9 - $0x7] sm:$0x80] %v422_v27 }

</bundles_post_ra>
